<compile_context>
chip_gen: v5e
topology: v5e:2x2
jax: 0.10.0
libtpu: 0.0.40
codegen_flags: <defaults>
</compile_context>

<pallas_src>
import numpy as np
import jax
import jax.numpy as jnp
from jax.experimental import pallas as pl
from jax.experimental.pallas import tpu as pltpu


def _normalize_kernel(x_ref, mean_ref, std_ref, o_ref):
    # One reciprocal on the (1, C) row per tile, then pure VPU work on (TB, C).
    inv = 1.0 / std_ref[...]
    o_ref[...] = (x_ref[...] - mean_ref[...]) * inv


def normalize(x: jax.Array, mean, std) -> jax.Array:
    """(x - mean) / std for 2-D x of shape (B, C); mean/std broadcastable to (C,)."""
    if x.ndim != 2:
        raise ValueError(
            "Expected tensor to be a tensor of size (B, C). Got {}.".format(x.shape)
        )
    if not jnp.issubdtype(x.dtype, jnp.floating):
        raise TypeError("Input tensor should be a float tensor. Got {}.".format(x.dtype))

    B, C = x.shape
    dtype = x.dtype

    # Host-only std==0 guard: only when std is host data (list / numpy), so the
    # hot path never pays a blocking device sync.
    if not isinstance(std, jax.Array):
        std_host = np.asarray(std, dtype=np.dtype(dtype))
        if np.any(std_host == 0):
            raise ValueError("std evaluated to zero, leading to division by zero.")
    # TODO(synk): device-resident std is not checked for zeros (would force a blocking sync).

    mean2d = jnp.asarray(mean, dtype=dtype).reshape(1, C)
    std2d = jnp.asarray(std, dtype=dtype).reshape(1, C)

    # --- Lane-densify when C < 128: pack R rows into one row of width R*C so
    #     stores are full-width (unmasked) vst.  Pure wrapper-side reshapes.
    x_k, mean_k, std_k = x, mean2d, std2d
    Bk, Ck = B, C
    packed = False
    if C < 128 and 128 % C == 0:
        R = 128 // C
        if B % R == 0:
            x_k = x.reshape(B // R, R * C)
            mean_k = jnp.tile(mean2d, (1, R))
            std_k = jnp.tile(std2d, (1, R))
            Bk, Ck = B // R, R * C
            packed = True

    # --- Tile size along rows: ~4 MiB per tile => ~16 MiB for the 2-in + 2-out
    #     double buffers, comfortably inside scoped VMEM on v5e/v6e/v7x.
    dtype_bytes = jnp.dtype(dtype).itemsize
    sub = 8 if dtype_bytes >= 4 else (16 if dtype_bytes == 2 else 32)
    target_tile_bytes = 4 * 1024 * 1024
    tb = max(sub, (target_tile_bytes // max(1, Ck * dtype_bytes)) // sub * sub)
    if tb >= Bk:
        tb = Bk  # whole array fits in one tile (block == full dim is always legal)

    grid = (pl.cdiv(Bk, tb),)

    out = pl.pallas_call(
        _normalize_kernel,
        out_shape=jax.ShapeDtypeStruct((Bk, Ck), dtype),
        grid_spec=pltpu.PrefetchScalarGridSpec(
            num_scalar_prefetch=0,
            grid=grid,
            in_specs=[
                pl.BlockSpec((tb, Ck), lambda i: (i, 0)),
                pl.BlockSpec((1, Ck), lambda i: (0, 0)),
                pl.BlockSpec((1, Ck), lambda i: (0, 0)),
            ],
            out_specs=pl.BlockSpec((tb, Ck), lambda i: (i, 0)),
        ),
        compiler_params=pltpu.CompilerParams(
            dimension_semantics=("parallel",),
            vmem_limit_bytes=32 * 1024 * 1024,
        ),
    )(x_k, mean_k, std_k)

    if packed:
        out = out.reshape(B, C)
    return out


if __name__ == "__main__":
    key = jax.random.PRNGKey(0)
    kx, km, ks = jax.random.split(key, 3)

    B, C = 8, 32
    x = jax.random.normal(kx, (B, C), dtype=jnp.float32)
    # Deterministic "parameters" of the module (mean / std per channel).
    mean = jax.random.normal(km, (C,), dtype=jnp.float32)
    std = jax.random.uniform(ks, (C,), dtype=jnp.float32, minval=0.5, maxval=1.5)

    out = normalize(x, mean, std)
    jax.block_until_ready(out)

    # Reference check in plain JAX.
    ref = (x - mean[None, :]) / std[None, :]
    assert jnp.allclose(out, ref, atol=1e-6, rtol=1e-6)

    print("KERNEL_OK")
</pallas_src>

<mosaic_0001>
module attributes {stable_mosaic.version = 11 : i64} {
  func.func @_normalize_kernel(%arg0: i32, %arg1: memref<2x128xf32, #tpu.memory_space<vmem>>, %arg2: memref<1x128xf32, #tpu.memory_space<vmem>>, %arg3: memref<1x128xf32, #tpu.memory_space<vmem>>, %arg4: memref<2x128xf32, #tpu.memory_space<vmem>>) attributes {dimension_semantics = [#tpu.dimension_semantics<parallel>], iteration_bounds = array<i64: 1>, scalar_prefetch = 0 : i64, scratch_operands = 0 : i64, tpu.core_type = #tpu.core_type<tc>, window_params = [{transform_indices = @transform_0, window_bounds = array<i64: 2, 128>}, {pipeline_mode = #tpu.pipeline_mode<synchronous>, transform_indices = @transform_1, window_bounds = array<i64: 1, 128>}, {pipeline_mode = #tpu.pipeline_mode<synchronous>, transform_indices = @transform_2, window_bounds = array<i64: 1, 128>}, {transform_indices = @transform_3, window_bounds = array<i64: 2, 128>}]} {
    %c0 = arith.constant 0 : index
    %c0_0 = arith.constant 0 : index
    %0 = vector.load %arg3[%c0, %c0_0] : memref<1x128xf32, #tpu.memory_space<vmem>>, vector<1x128xf32>
    %cst = arith.constant 1.000000e+00 : f32
    %1 = vector.broadcast %cst : f32 to vector<1x128xf32>
    %2 = arith.divf %1, %0 : vector<1x128xf32>
    %c0_1 = arith.constant 0 : index
    %c0_2 = arith.constant 0 : index
    %3 = vector.load %arg1[%c0_1, %c0_2] : memref<2x128xf32, #tpu.memory_space<vmem>>, vector<2x128xf32>
    %c0_3 = arith.constant 0 : index
    %c0_4 = arith.constant 0 : index
    %4 = vector.load %arg2[%c0_3, %c0_4] : memref<1x128xf32, #tpu.memory_space<vmem>>, vector<1x128xf32>
    %5 = vector.broadcast %4 : vector<1x128xf32> to vector<2x128xf32>
    %6 = arith.subf %3, %5 : vector<2x128xf32>
    %7 = vector.broadcast %2 : vector<1x128xf32> to vector<2x128xf32>
    %8 = arith.mulf %6, %7 : vector<2x128xf32>
    %c0_5 = arith.constant 0 : index
    %c0_6 = arith.constant 0 : index
    %9 = vector.load %arg4[%c0_5, %c0_6] : memref<2x128xf32, #tpu.memory_space<vmem>>, vector<2x128xf32>
    tpu.vector_store %arg4[%c0_5, %c0_6], %8 {strides = array<i32>} : memref<2x128xf32, #tpu.memory_space<vmem>>, vector<2x128xf32>,
    return
  }
  func.func @transform_0(%arg0: i32) -> (i32, i32) {
    %c0_i32 = arith.constant 0 : i32
    %c0_i32_0 = arith.constant 0 : i32
    return %arg0, %c0_i32 : i32, i32
  }
  func.func @transform_1(%arg0: i32) -> (i32, i32) {
    %c0_i32 = arith.constant 0 : i32
    %c0_i32_0 = arith.constant 0 : i32
    %c0_i32_1 = arith.constant 0 : i32
    return %c0_i32, %c0_i32_0 : i32, i32
  }
  func.func @transform_2(%arg0: i32) -> (i32, i32) {
    %c0_i32 = arith.constant 0 : i32
    %c0_i32_0 = arith.constant 0 : i32
    %c0_i32_1 = arith.constant 0 : i32
    return %c0_i32, %c0_i32_0 : i32, i32
  }
  func.func @transform_3(%arg0: i32) -> (i32, i32) {
    %c0_i32 = arith.constant 0 : i32
    %c0_i32_0 = arith.constant 0 : i32
    return %arg0, %c0_i32 : i32, i32
  }
}

</mosaic_0001>

<bundles_post_ra>
// kernel: tpu_custom_call.1
= control target key start
LH: loop header
LB: loop body
LE: loop exit
PB: predicated region body
PF: predicated region fallthrough
CT: control target
= control target key end

     0   :  { %8 = vsyncpa [#allocation3], 0  ;;  %s207_s0 = inlined_call_operand.hbm [shape: f32[2,128], index: 0, kind: input, shape index: {}]   ;;  %s208_s1 = inlined_call_operand.hbm [shape: f32[1,128], index: 1, kind: input, shape index: {}]   ;;  %s209_s2 = inlined_call_operand.vmem [shape: f32[1,128], index: 2, kind: input, shape index: {}]   ;;  %s210_s3 = inlined_call_operand.hbm [shape: f32[2,128], index: 3, kind: output, shape index: {}]  }
   0x1   :  { %9 = vsyncpa [#allocation6], 0 }
   0x2   :  { %10 = vsyncpa [#allocation4], 0  ;;  %s16_s14 = sshll.u32 %s207_s0, 4  ;;  %s172_s15 = smov [#allocation2]   ;;  %s17_s14 = int_to_ptr.hbm [resolvable:$true] %s16_s14 }
   0x3   :  { %s18_s16 = sshll.u32 %s172_s15, 4  ;;  %s27_s19 = sshll.u32 %s208_s1, 4  ;;  %s19_s16 = int_to_ptr.vmem [resolvable:$true] %s18_s16  ;;  %s28_s19 = int_to_ptr.hbm [resolvable:$true] %s27_s19 }
   0x4   :  { %21 = dma.hbm_to_vmem [thread:$0]  %s17_s14, 32, %s19_s16, [#allocation3]  }
   0x5   :  { %s173_s20 = smov [#allocation5]  }
   0x6   :  { %s29_s21 = sshll.u32 %s173_s20, 4  ;;  %s30_s21 = int_to_ptr.vmem [resolvable:$true] %s29_s21 }
   0x7   :  { %32 = dma.hbm_to_vmem [thread:$0]  %s28_s19, 16, %s30_s21, [#allocation6]  }
   0x8   :  { %166 = dma.done.wait [#allocation3], 32  }
   0x9   :  { %167 = vsyncadd [#allocation3], 4294967264 }
   0xa   :  { %168 = dma.done.wait [#allocation6], 16  }
   0xb   :  { %169 = vsyncadd [#allocation6], 4294967280  ;;  %v43_v0 = vld [vmem:[%s209_s2] sm:$0x1]  ;;  %v91_v7 = vld [vmem:[#allocation5] ss:$0 sm:$0xff] }
   0xc   :  { %92 = vrcp.f32 %v43_v0  ;;  %v55_v3 = vand.u32 2147483648, %v43_v0  ;;  %vm49_vm0 = vweird.f32 %v43_v0  ;;  %v53_v5 = vand.u32 2147483647, %v43_v0  ;;  %v59_v9 = vld [vmem:[#allocation2] sm:$0x3]  ;;  %s174_s1 = smov [#allocation7]  }
   0xd   :  { %v64_v12 = vsub.f32 %v59_v9, %v91_v7  ;;  %s75_s2 = sshll.u32 %s174_s1, 4  ;;  %s77_s25 = sshll.u32 %s210_s3, 4  ;;  %s76_s2 = int_to_ptr.vmem [resolvable:$true] %s75_s2  ;;  %s78_s25 = int_to_ptr.hbm [resolvable:$true] %s77_s25 }
   0xe   :  { %v56_v8 = vor.u32 1.1754944e-38, %v55_v3  ;;  %vm54_vm3 = vcmp.eq.f32.partialorder %v53_v5, 8.507059e+37 }
  0x12   :  { %v93_v1 = vpop.eup %92 }
  0x13   :  { %v45_v2 = vmul.f32 %v93_v1, %v43_v0  ;;  %vm50_vm1 = vweird.f32 %v93_v1 }
  0x14   :  { %vm51_vm2 = vmor %vm49_vm0, %vm50_vm1 }
  0x15   :  { %v46_v4 = vsub.f32 1.0, %v45_v2 }
  0x17   :  { %v47_v6 = vmul.f32 %v93_v1, %v46_v4 }
  0x19   :  { %v48_v10 = vadd.f32 %v93_v1, %v47_v6 }
  0x1b   :  { %v52_v11 = vsel %vm51_vm2, %v93_v1, %v48_v10 }
  0x1c   :  { %v57_v13 = vsel %vm54_vm3, %v56_v8, %v52_v11 }
  0x1d   :  { %v66_v14 = vperm.slane %v57_v13, 0 }
  0x1f   :  { %v68_v15 = vmul.f32 %v66_v14, %v64_v12 }
  0x21   :  { %69 = vst [vmem:[#allocation7] sm:$0x3] %v68_v15 }
  0x22   :  { %80 = dma.vmem_to_hbm [thread:$0]  %s76_s2, 32, %s78_s25, [#allocation4]  }
  0x23   :  { %170 = dma.done.wait [#allocation4], 32  }
  0x24   :  { %171 = vsyncadd [#allocation4], 4294967264 }
  0x25   :  { %85 = vsyncpa [#allocation3], 1 }
  0x26   :  { %86 = vsyncpa [#allocation6], 1 }
  0x27   :  { %87 = vsyncpa [#allocation4], 1 }

</bundles_post_ra>
